<compile_context>
chip_gen: v7x
topology: tpu7x:2x2x1
jax: 0.10.0
libtpu: 0.0.40
codegen_flags: <defaults>
</compile_context>

<pallas_src>
import numpy as np
import jax
import jax.numpy as jnp
from jax.experimental import pallas as pl
from jax.experimental.pallas import tpu as pltpu


# ------------------------------------------------------------------ kernel ---

def _cycling_kernel(x_ref, w1_ref, b1_ref, w2_ref, b2_ref, out_ref):
    # Accept f32 or bf16 input tiles; all math in f32 (MXU accumulates in f32,
    # epilogues on the VPU f32 path -- v5e friendly).
    x = x_ref[...].astype(jnp.float32)

    # Packed layer 1 of all three heads: [tb, D] @ [D, 3*half] -> f32, bias + ReLU.
    h = jnp.dot(x, w1_ref[...], preferred_element_type=jnp.float32) + b1_ref[...]
    h = jnp.maximum(h, 0.0)

    # Packed block-diagonal layer 2 (zero-padded to 128 lane-dense output cols).
    y = jnp.dot(h, w2_ref[...], preferred_element_type=jnp.float32) + b2_ref[...]

    # bf16 writeback halves the output HBM stream; still a lane-dense unmasked store.
    out_ref[...] = y.astype(out_ref.dtype)


# ---------------------------------------------------------------- parameters -

_HEAD_OUT_DIMS = (3, 2, 2)   # capacity_fade(3), impedance_growth(2), thermal(2)
_OUT_NAMES = ('capacity_fade_rate', 'long_term_fade_rate', 'fade_knee_point',
              'sei_resistance_growth', 'charge_transfer_resistance',
              'heat_generation_rate', 'thermal_stability')
_OUT_PAD = 128               # lane-dense padded output width


def init_params(key, feature_dim=128, out_pad=_OUT_PAD):
    """Packed, pre-transposed (x @ W) parameters; everything f32 (fp32 module parity)."""
    half = feature_dim // 2
    n_heads = len(_HEAD_OUT_DIMS)
    total_out = sum(_HEAD_OUT_DIMS)
    assert out_pad >= total_out

    def lin(k, fan_in, fan_out):
        kw, kb = jax.random.split(k)
        w = jax.random.normal(kw, (fan_in, fan_out), jnp.float32) / jnp.sqrt(float(fan_in))
        b = 0.01 * jax.random.normal(kb, (1, fan_out), jnp.float32)
        return w, b

    keys = jax.random.split(key, 2 * n_heads)
    w1_cols, b1_cols = [], []
    w2_np = np.zeros((n_heads * half, out_pad), dtype=np.float32)
    b2_np = np.zeros((1, out_pad), dtype=np.float32)
    col = 0
    for j, out_dim in enumerate(_HEAD_OUT_DIMS):
        wa, ba = lin(keys[2 * j], feature_dim, half)       # Linear(D -> D//2)
        wb, bb = lin(keys[2 * j + 1], half, out_dim)       # Linear(D//2 -> out_dim)
        w1_cols.append(wa)
        b1_cols.append(ba)
        w2_np[j * half:(j + 1) * half, col:col + out_dim] = np.asarray(wb)
        b2_np[:, col:col + out_dim] = np.asarray(bb)
        col += out_dim

    w1 = jnp.concatenate(w1_cols, axis=1)                  # [D, 3*half]      f32
    b1 = jnp.concatenate(b1_cols, axis=1)                  # [1, 3*half]      f32
    w2 = jnp.asarray(w2_np)                                # [3*half, 128]    f32 block-diag
    b2 = jnp.asarray(b2_np)                                # [1, 128]         f32
    return dict(w1=w1, b1=b1, w2=w2, b2=b2)


# ------------------------------------------------------------------ wrapper --

def _round_up8(n):
    return ((n + 7) // 8) * 8


def cycling_forward(macro_features, params, nano_outputs=None, *,
                    tile_b=2048, min_grid_steps=4):
    """Fused Pallas forward of CyclingDynamicsModel.

    `nano_outputs` is accepted for signature parity with the PyTorch module but is
    unused (the original forward never reads it).  `macro_features` may be f32 or
    bf16; feed bf16 straight from the producer to halve the input HBM stream.
    """
    del nano_outputs
    B, D = macro_features.shape
    w1, b1, w2, b2 = params['w1'], params['b1'], params['w2'], params['b2']
    H3 = w1.shape[1]           # 3 * (D // 2)
    OUT = w2.shape[1]          # lane-dense padded output width (128)

    # Batch tile: multiple of 8 sublanes; large by default to amortize the ~0.35 us
    # per-grid-step overhead, but capped so the grid keeps >= min_grid_steps steps so
    # v7x's two TensorCores can split the "parallel" batch axis.
    tb_cap = _round_up8(pl.cdiv(B, max(1, min_grid_steps)))
    tb = max(8, min(tile_b, tb_cap))
    grid = (pl.cdiv(B, tb),)

    flops = 2 * B * (D * H3 + H3 * OUT)
    bytes_accessed = (macro_features.size * macro_features.dtype.itemsize
                      + (w1.size + b1.size + w2.size + b2.size) * 4
                      + B * OUT * 2)                       # bf16 output slab

    out_bf16 = pl.pallas_call(
        _cycling_kernel,
        out_shape=jax.ShapeDtypeStruct((B, OUT), jnp.bfloat16),
        grid_spec=pltpu.PrefetchScalarGridSpec(
            num_scalar_prefetch=0,
            grid=grid,
            in_specs=[
                pl.BlockSpec((tb, D), lambda i: (i, 0)),      # x: tiled over batch
                pl.BlockSpec((D, H3), lambda i: (0, 0)),      # w1: VMEM-resident
                pl.BlockSpec((1, H3), lambda i: (0, 0)),      # b1: VMEM-resident
                pl.BlockSpec((H3, OUT), lambda i: (0, 0)),    # w2: VMEM-resident
                pl.BlockSpec((1, OUT), lambda i: (0, 0)),     # b2: VMEM-resident
            ],
            out_specs=pl.BlockSpec((tb, OUT), lambda i: (i, 0)),
        ),
        compiler_params=pltpu.CompilerParams(
            dimension_semantics=("parallel",),                # megacore split on v7x
            vmem_limit_bytes=32 * 1024 * 1024,
        ),
        cost_estimate=pl.CostEstimate(
            flops=flops, transcendentals=0, bytes_accessed=bytes_accessed),
    )(macro_features, w1, b1, w2, b2)

    # Single slice of the slab + one cast back to f32; the dict columns are views of
    # this small (B, 7) array rather than 7 separate slices of the padded slab.
    real = out_bf16[:, :len(_OUT_NAMES)].astype(jnp.float32)
    return {name: real[:, i:i + 1] for i, name in enumerate(_OUT_NAMES)}


# Pure-JAX f32 reference (same math as the PyTorch fp32 module).
def _reference(macro_features, p):
    x = macro_features.astype(jnp.float32)
    h = jnp.maximum(jnp.dot(x, p['w1']) + p['b1'], 0.0)
    return jnp.dot(h, p['w2']) + p['b2']


if __name__ == "__main__":
    key = jax.random.PRNGKey(0)
    k_x, k_p = jax.random.split(key)

    B, D = 16, 128                      # small shapes consistent with feature_dim=128
    macro_features = jax.random.normal(k_x, (B, D), jnp.float32)
    params = init_params(k_p, feature_dim=D)

    outputs = cycling_forward(macro_features, params, nano_outputs={})
    jax.block_until_ready(outputs)

    # Correctness vs the pure-f32 reference; tolerance covers the bf16 output rounding
    # (and any default-precision matmul rounding on either side).
    ref = _reference(macro_features, params)
    for i, name in enumerate(_OUT_NAMES):
        assert outputs[name].shape == (B, 1), name
        assert jnp.allclose(outputs[name], ref[:, i:i + 1], atol=3e-2, rtol=3e-2), name

    print("KERNEL_OK")
</pallas_src>

<mosaic_0001>
module attributes {stable_mosaic.version = 11 : i64} {
  func.func @_cycling_kernel(%arg0: i32, %arg1: memref<8x128xf32, #tpu.memory_space<vmem>>, %arg2: memref<128x192xf32, #tpu.memory_space<vmem>>, %arg3: memref<1x192xf32, #tpu.memory_space<vmem>>, %arg4: memref<192x128xf32, #tpu.memory_space<vmem>>, %arg5: memref<1x128xf32, #tpu.memory_space<vmem>>, %arg6: memref<8x128xbf16, #tpu.memory_space<vmem>>) attributes {dimension_semantics = [#tpu.dimension_semantics<parallel>], iteration_bounds = array<i64: 2>, scalar_prefetch = 0 : i64, scratch_operands = 0 : i64, tpu.core_type = #tpu.core_type<tc>, window_params = [{transform_indices = @transform_0, window_bounds = array<i64: 8, 128>}, {pipeline_mode = #tpu.pipeline_mode<synchronous>, transform_indices = @transform_1, window_bounds = array<i64: 128, 192>}, {pipeline_mode = #tpu.pipeline_mode<synchronous>, transform_indices = @transform_2, window_bounds = array<i64: 1, 192>}, {pipeline_mode = #tpu.pipeline_mode<synchronous>, transform_indices = @transform_3, window_bounds = array<i64: 192, 128>}, {pipeline_mode = #tpu.pipeline_mode<synchronous>, transform_indices = @transform_4, window_bounds = array<i64: 1, 128>}, {transform_indices = @transform_5, window_bounds = array<i64: 8, 128>}]} {
    %c0 = arith.constant 0 : index
    %c0_0 = arith.constant 0 : index
    %0 = vector.load %arg1[%c0, %c0_0] : memref<8x128xf32, #tpu.memory_space<vmem>>, vector<8x128xf32>
    %c0_1 = arith.constant 0 : index
    %c0_2 = arith.constant 0 : index
    %1 = vector.load %arg2[%c0_1, %c0_2] : memref<128x192xf32, #tpu.memory_space<vmem>>, vector<128x192xf32>
    %cst = arith.constant dense<0.000000e+00> : vector<8x192xf32>
    %2 = tpu.matmul %0, %1, %cst {dimension_numbers = #tpu.dot_dimension_numbers<[1], [0], [0], [1], [0, 0, 1, 1], [], []>} : vector<8x128xf32>, vector<128x192xf32>, vector<8x192xf32> -> vector<8x192xf32>
    %c0_3 = arith.constant 0 : index
    %c0_4 = arith.constant 0 : index
    %3 = vector.load %arg3[%c0_3, %c0_4] : memref<1x192xf32, #tpu.memory_space<vmem>>, vector<1x192xf32>
    %4 = vector.broadcast %3 : vector<1x192xf32> to vector<8x192xf32>
    %5 = arith.addf %2, %4 : vector<8x192xf32>
    %cst_5 = arith.constant 0.000000e+00 : f32
    %6 = vector.broadcast %cst_5 : f32 to vector<8x192xf32>
    %7 = arith.maximumf %5, %6 : vector<8x192xf32>
    %c0_6 = arith.constant 0 : index
    %c0_7 = arith.constant 0 : index
    %8 = vector.load %arg4[%c0_6, %c0_7] : memref<192x128xf32, #tpu.memory_space<vmem>>, vector<192x128xf32>
    %cst_8 = arith.constant dense<0.000000e+00> : vector<8x128xf32>
    %9 = tpu.matmul %7, %8, %cst_8 {dimension_numbers = #tpu.dot_dimension_numbers<[1], [0], [0], [1], [0, 0, 1, 1], [], []>} : vector<8x192xf32>, vector<192x128xf32>, vector<8x128xf32> -> vector<8x128xf32>
    %c0_9 = arith.constant 0 : index
    %c0_10 = arith.constant 0 : index
    %10 = vector.load %arg5[%c0_9, %c0_10] : memref<1x128xf32, #tpu.memory_space<vmem>>, vector<1x128xf32>
    %11 = vector.broadcast %10 : vector<1x128xf32> to vector<8x128xf32>
    %12 = arith.addf %9, %11 : vector<8x128xf32>
    %13 = arith.truncf %12 : vector<8x128xf32> to vector<8x128xbf16>
    %c0_11 = arith.constant 0 : index
    %c0_12 = arith.constant 0 : index
    %14 = vector.load %arg6[%c0_11, %c0_12] : memref<8x128xbf16, #tpu.memory_space<vmem>>, vector<8x128xbf16>
    tpu.vector_store %arg6[%c0_11, %c0_12], %13 {strides = array<i32>} : memref<8x128xbf16, #tpu.memory_space<vmem>>, vector<8x128xbf16>,
    return
  }
  func.func @transform_0(%arg0: i32) -> (i32, i32) {
    %c0_i32 = arith.constant 0 : i32
    %c0_i32_0 = arith.constant 0 : i32
    return %arg0, %c0_i32 : i32, i32
  }
  func.func @transform_1(%arg0: i32) -> (i32, i32) {
    %c0_i32 = arith.constant 0 : i32
    %c0_i32_0 = arith.constant 0 : i32
    %c0_i32_1 = arith.constant 0 : i32
    return %c0_i32, %c0_i32_0 : i32, i32
  }
  func.func @transform_2(%arg0: i32) -> (i32, i32) {
    %c0_i32 = arith.constant 0 : i32
    %c0_i32_0 = arith.constant 0 : i32
    %c0_i32_1 = arith.constant 0 : i32
    return %c0_i32, %c0_i32_0 : i32, i32
  }
  func.func @transform_3(%arg0: i32) -> (i32, i32) {
    %c0_i32 = arith.constant 0 : i32
    %c0_i32_0 = arith.constant 0 : i32
    %c0_i32_1 = arith.constant 0 : i32
    return %c0_i32, %c0_i32_0 : i32, i32
  }
  func.func @transform_4(%arg0: i32) -> (i32, i32) {
    %c0_i32 = arith.constant 0 : i32
    %c0_i32_0 = arith.constant 0 : i32
    %c0_i32_1 = arith.constant 0 : i32
    return %c0_i32, %c0_i32_0 : i32, i32
  }
  func.func @transform_5(%arg0: i32) -> (i32, i32) {
    %c0_i32 = arith.constant 0 : i32
    %c0_i32_0 = arith.constant 0 : i32
    return %arg0, %c0_i32 : i32, i32
  }
}

</mosaic_0001>

<bundles_post_ra>
// kernel: tpu_custom_call.1
= control target key start
LH: loop header
LB: loop body
LE: loop exit
PB: predicated region body
PF: predicated region fallthrough
CT: control target
= control target key end

     0   :  { %10 = vsyncpa [#allocation3], 0  ;;  %s1024_s0 = inlined_call_operand.vmem [shape: f32[16,128], index: 0, kind: input, shape index: {}]   ;;  %s1025_s1 = inlined_call_operand.vmem [shape: f32[128,192], index: 1, kind: input, shape index: {}]   ;;  %s1026_s2 = inlined_call_operand.vmem [shape: f32[1,192], index: 2, kind: input, shape index: {}]   ;;  %s1027_s3 = inlined_call_operand.vmem [shape: f32[192,128], index: 3, kind: input, shape index: {}]   ;;  %s1028_s4 = inlined_call_operand.vmem [shape: f32[1,128], index: 4, kind: input, shape index: {}]   ;;  %s1029_s5 = inlined_call_operand.hbm [shape: bf16[16,128], index: 5, kind: output, shape index: {}]  }
   0x1   :  { %12 = vsyncpa [#allocation3 + $0x1], 0  ;;  %s736_s18 = smov 0   ;;  %s738_s19 = smov 0  }
   0x2   :  { %s740_s20 = smov 0   ;;  %s742_s21 = smov 0  }
   0x3 LB: > { %s757_s22 = sadd.s32 4294967295, %s701_s21   ;;  %s518_s23 = sadd.s32 4294967294, %s701_s21   ;;  %s701_s21 = sphi %s742_s21, %s1035_s21   ;;  %s697_s20 = sphi %s740_s20, %s1034_s20   ;;  %s693_s19 = sphi %s738_s19, %s1033_s19   ;;  %s689_s18 = sphi %s736_s18, %s1032_s18  }
   0x4   : > { %s761_s24 = sadd.s32 1, %s701_s21   ;;  %s135_s25 = sadd.s32 1, %s697_s20 }
   0x5   : > { %s132_s26 = ssub.s32 %s701_s21, %s761_s24  ;;  %p145_p0 = scmp.ne.s32.totalorder %s697_s20, %s693_s19 }
   0x6   : > { %p133_p1 = scmp.eq.s32.totalorder %s132_s26, 0  ;;  %p146_p2 = scmp.eq.s32.totalorder %s757_s22, 1 }
   0x7   : > { %p151_p3 = scmp.ne.s32.totalorder %s693_s19, %s689_s18  ;;  %p152_p4 = scmp.eq.s32.totalorder %s518_s23, 1 }
   0x8   : > { %s772_s27 = scalar_select %p133_p1, %s697_s20, %s135_s25  }
   0x9   : > { %p774_p5 = por %p146_p2, %p145_p0  ;;  %p778_p6 = por %p152_p4, %p151_p3 }
   0xa   : > { %p521_p7 = scmp.ge.s32.totalorder %s701_s21, 1  ;;  %p189_p8 = scmp.lt.s32.totalorder %s701_s21, 3 }
   0xc   : > { %p190_p9 = pnand %p521_p7, %p189_p8 }
   0xd   : > { %v222_v0 = vld [vmem:[%s1025_s1 + $0x8] sm:$0xff] (!%p190_p9)  ;;  %v224_v1 = vld [vmem:[%s1025_s1 + $0x18] sm:$0xff] (!%p190_p9)  ;;  %v221_v2 = vld [vmem:[%s1025_s1] sm:$0xff] (!%p190_p9)  ;;  %v703_v7 = vmov (!%p190_p9), 0.0   ;;  %v704_v8 = vmov (!%p190_p9), 0.0|0.0   ;;  %p216_p10 = scmp.lt.s32.totalorder (!%p190_p9), %s757_s22, 1 }
   0xe   : > { %193 = sbr.rel (%p190_p9) target bundleno = 496 (0x1f0), region = 40  ;;  %v530_v3 = vpack.c.bf16 (!%p190_p9), %v224_v1, %v222_v0  ;;  %v223_v4 = vld [vmem:[%s1025_s1 + $0x10] sm:$0xff] (!%p190_p9)  ;;  %v226_v5 = vld [vmem:[%s1025_s1 + $0x28] sm:$0xff] (!%p190_p9)  ;;  %v228_v6 = vld [vmem:[%s1025_s1 + $0x38] sm:$0xff] (!%p190_p9)  ;;  %329 = vmatprep.mubr.f32.mxu0 (!%p190_p9), %v703_v7  ;;  %562 = vmatprep.subr.bf16.mxu1 (!%p190_p9), %v704_v8  ;;  %vm369_vm0 = vcmask (!%p190_p9), 523264   ;;  %s213_s12 = sand.u32 (!%p190_p9), 1, %s693_s19  }
   0xf   : > { %v532_v9 = vpack.c.bf16 (!%p190_p9), %v223_v4, %v221_v2  ;;  %v534_v10 = vpack.c.bf16 (!%p190_p9), %v228_v6, %v226_v5  ;;  %v225_v11 = vld [vmem:[%s1025_s1 + $0x20] sm:$0xff] (!%p190_p9)  ;;  %v227_v12 = vld [vmem:[%s1025_s1 + $0x30] sm:$0xff] (!%p190_p9)  ;;  %v230_v13 = vld [vmem:[%s1025_s1 + $0x48] sm:$0xff] (!%p190_p9)  ;;  %s522_s13 = sshll.u32 (!%p190_p9), %s213_s12, 2  ;;  %s527_s16 = sshll.u32 (!%p190_p9), %s757_s22, 6 }
  0x10   : > { %531 = vmatprep.subr.bf16.mxu0 (!%p190_p9), %v530_v3  ;;  %v232_v14 = vld [vmem:[%s1025_s1 + $0x58] sm:$0xff] (!%p190_p9)  ;;  %v536_v15 = vpack.c.bf16 (!%p190_p9), %v227_v12, %v225_v11  ;;  %v229_v17 = vld [vmem:[%s1025_s1 + $0x40] sm:$0xff] (!%p190_p9)  ;;  %v231_v18 = vld [vmem:[%s1025_s1 + $0x50] sm:$0xff] (!%p190_p9)  ;;  %s982_s30 = scalar_lea.hbm (!%p190_p9), %s1029_s5, %s527_s16  ;;  %s446_s6 = scalar_lea.sflag (!%p190_p9), [#allocation3], %s213_s12 }
  0x11   : > { %533 = vmatpush1.bf16.msra.mxu0 (!%p190_p9), %v532_v9  ;;  %v538_v16 = vpack.c.bf16 (!%p190_p9), %v232_v14, %v230_v13  ;;  %v234_v19 = vld [vmem:[%s1025_s1 + $0x68] sm:$0xff] (!%p190_p9)  ;;  %v236_v20 = vld [vmem:[%s1025_s1 + $0x78] sm:$0xff] (!%p190_p9)  ;;  %v540_v21 = vpack.c.bf16 (!%p190_p9), %v231_v18, %v229_v17  ;;  %v233_v23 = vld [vmem:[%s1025_s1 + $0x60] sm:$0xff] (!%p190_p9) }
  0x12   : > { %535 = vmatprep.subr.bf16.mxu0 (!%p190_p9), %v534_v10  ;;  %v542_v22 = vpack.c.bf16 (!%p190_p9), %v236_v20, %v234_v19  ;;  %v235_v24 = vld [vmem:[%s1025_s1 + $0x70] sm:$0xff] (!%p190_p9)  ;;  %v238_v25 = vld [vmem:[%s1025_s1 + $0x88] sm:$0xff] (!%p190_p9)  ;;  %v240_v26 = vld [vmem:[%s1025_s1 + $0x98] sm:$0xff] (!%p190_p9) }
  0x13   : > { %v338_v27 = vld [vmem:[%s1027_s3] sm:$0xff] (!%p190_p9)  ;;  %v339_v28 = vld [vmem:[%s1027_s3 + $0x8] sm:$0xff] (!%p190_p9)  ;;  %v340_v29 = vld [vmem:[%s1027_s3 + $0x10] sm:$0xff] (!%p190_p9)  ;;  %v544_v30 = vpack.c.bf16 (!%p190_p9), %v235_v24, %v233_v23  ;;  %v546_v33 = vpack.c.bf16 (!%p190_p9), %v240_v26, %v238_v25  ;;  %v255_v24 = vlaneseq (!%p190_p9) }
  0x14   : > { %v563_v31 = vpack.c.bf16 (!%p190_p9), %v339_v28, %v338_v27  ;;  %v341_v32 = vld [vmem:[%s1027_s3 + $0x18] sm:$0xff] (!%p190_p9)  ;;  %v237_v34 = vld [vmem:[%s1025_s1 + $0x80] sm:$0xff] (!%p190_p9)  ;;  %v239_v35 = vld [vmem:[%s1025_s1 + $0x90] sm:$0xff] (!%p190_p9) }
  0x15   : > { %537 = vmatpush1.bf16.msra.mxu0 %v536_v15  ;;  %v242_v36 = vld [vmem:[%s1025_s1 + $0xa8] sm:$0xff]  ;;  %v244_v37 = vld [vmem:[%s1025_s1 + $0xb8] sm:$0xff]  ;;  %v566_v38 = vpack.c.bf16 %v341_v32, %v340_v29  ;;  %v342_v39 = vld [vmem:[%s1027_s3 + $0x20] sm:$0xff]  ;;  %v548_v41 = vpack.c.bf16 %v239_v35, %v237_v34  ;;  %s217_s17 = scalar_select %p216_p10, %s757_s22, 1  ;;  %v256_v25 = vshrl.u32 %v255_v24, 7 }
  0x16   : > { %539 = vmatprep.subr.bf16.mxu0 %v538_v16  ;;  %564 = vmatpush1.bf16.msra.mxu1 %v563_v31  ;;  %v343_v40 = vld [vmem:[%s1027_s3 + $0x28] sm:$0xff]  ;;  %v550_v42 = vpack.c.bf16 %v244_v37, %v242_v36  ;;  %v241_v43 = vld [vmem:[%s1025_s1 + $0xa0] sm:$0xff]  ;;  %v243_v44 = vld [vmem:[%s1025_s1 + $0xb0] sm:$0xff]  ;;  %s705_s22 = smov [#allocation2]  }
  0x17   : > { %565 = vmatprep.subr.bf16.mxu1 %v704_v8  ;;  %v246_v45 = vld [vmem:[%s1025_s1 + $0xc8] sm:$0xff]  ;;  %v248_v46 = vld [vmem:[%s1025_s1 + $0xd8] sm:$0xff]  ;;  %v569_v47 = vpack.c.bf16 %v343_v40, %v342_v39  ;;  %v344_v48 = vld [vmem:[%s1027_s3 + $0x30] sm:$0xff]  ;;  %v552_v50 = vpack.c.bf16 %v243_v44, %v241_v43  ;;  %s523_s10 = sshll.u32 %s217_s17, 3  ;;  %v257_v26 = vsub.s32 0, %v256_v25  ;;  %v261_v28 = vsub.s32 1, %v256_v25 }
  0x18   : > { %v345_v49 = vld [vmem:[%s1027_s3 + $0x38] sm:$0xff]  ;;  %v554_v51 = vpack.c.bf16 %v248_v46, %v246_v45  ;;  %v245_v52 = vld [vmem:[%s1025_s1 + $0xc0] sm:$0xff]  ;;  %v247_v53 = vld [vmem:[%s1025_s1 + $0xd0] sm:$0xff]  ;;  %s219_s23 = scalar_lea.vmem %s1024_s0, %s523_s10  ;;  %s643_s8 = sshll.u32 %s705_s22, 4  ;;  %s644_s8 = int_to_ptr.vmem [resolvable:$false] %s643_s8 }
  0x19   : > { %541 = vmatpush1.bf16.msra.mxu0 %v540_v21  ;;  %v250_v54 = vld [vmem:[%s1025_s1 + $0xe8] sm:$0xff]  ;;  %v252_v55 = vld [vmem:[%s1025_s1 + $0xf8] sm:$0xff]  ;;  %v572_v56 = vpack.c.bf16 %v345_v49, %v344_v48  ;;  %v346_v57 = vld [vmem:[%s1027_s3 + $0x40] sm:$0xff]  ;;  %v556_v59 = vpack.c.bf16 %v247_v53, %v245_v52  ;;  %s645_s9 = scalar_lea.vmem %s644_s8, 128 }
  0x1a   : > { %543 = vmatprep.subr.bf16.mxu0 %v542_v22  ;;  %567 = vmatpush1.bf16.msra.mxu1 %v566_v38  ;;  %v347_v58 = vld [vmem:[%s1027_s3 + $0x48] sm:$0xff]  ;;  %v558_v60 = vpack.c.bf16 %v252_v55, %v250_v54  ;;  %v249_v61 = vld [vmem:[%s1025_s1 + $0xe0] sm:$0xff]  ;;  %v251_v62 = vld [vmem:[%s1025_s1 + $0xf0] sm:$0xff] }
  0x1b   : > { %568 = vmatprep.subr.bf16.mxu1 %v704_v8  ;;  %v575_v63 = vpack.c.bf16 %v347_v58, %v346_v57  ;;  %v348_v0 = vld [vmem:[%s1027_s3 + $0x50] sm:$0xff]  ;;  %v349_v1 = vld [vmem:[%s1027_s3 + $0x58] sm:$0xff]  ;;  %v560_v2 = vpack.c.bf16 %v251_v62, %v249_v61  ;;  %v350_v4 = vld [vmem:[%s1027_s3 + $0x60] sm:$0xff] }
  0x1c   : > { %v578_v3 = vpack.c.bf16 %v349_v1, %v348_v0  ;;  %v351_v5 = vld [vmem:[%s1027_s3 + $0x68] sm:$0xff]  ;;  %v220_v6 = vld [vmem:[%s219_s23] sm:$0xff]  ;;  %v352_v9 = vld [vmem:[%s1027_s3 + $0x70] sm:$0xff]  ;;  %s215_s23 = scalar_lea.vmem [#allocation2], %s522_s13 }
  0x1d   : > { %545 = vmatpush1.bf16.msra.mxu0 %v544_v30  ;;  %v581_v7 = vpack.c.bf16 %v351_v5, %v350_v4  ;;  %v353_v10 = vld [vmem:[%s1027_s3 + $0x78] sm:$0xff]  ;;  %v354_v12 = vld [vmem:[%s1027_s3 + $0x80] sm:$0xff]  ;;  %v355_v13 = vld [vmem:[%s1027_s3 + $0x88] sm:$0xff]  ;;  %s459_s17 = sshll.u32 %s215_s23, 4  ;;  %s984_s17 = int_to_ptr.vmem [resolvable:$true] %s459_s17 }
  0x1e   : > { %547 = vmatprep.subr.bf16.mxu0 %v546_v33  ;;  %570 = vmatpush1.bf16.msra.mxu1 %v569_v47  ;;  %v584_v11 = vpack.c.bf16 %v353_v10, %v352_v9  ;;  %v587_v14 = vpack.c.bf16 %v355_v13, %v354_v12  ;;  %v356_v15 = vld [vmem:[%s1027_s3 + $0x90] sm:$0xff]  ;;  %v357_v16 = vld [vmem:[%s1027_s3 + $0x98] sm:$0xff]  ;;  %v358_v18 = vld [vmem:[%s1027_s3 + $0xa0] sm:$0xff]  ;;  %s639_s7 = scalar_lea.vmem %s984_s17, 64  ;;  %p646_p0 = scmp.lt.s32.totalorder %s984_s17, %s644_s8 }
  0x1f   : > { %571 = vmatprep.subr.bf16.mxu1 %v704_v8  ;;  %v590_v17 = vpack.c.bf16 %v357_v16, %v356_v15  ;;  %v359_v19 = vld [vmem:[%s1027_s3 + $0xa8] sm:$0xff]  ;;  %v360_v21 = vld [vmem:[%s1027_s3 + $0xb0] sm:$0xff]  ;;  %v361_v22 = vld [vmem:[%s1027_s3 + $0xb8] sm:$0xff]  ;;  %p640_p11 = scmp.ne.s32.totalorder %s984_s17, %s639_s7  ;;  %p647_p1 = scmp.lt.s32.totalorder %s645_s9, %s639_s7 }
  0x20   : > { %v593_v20 = vpack.c.bf16 %v359_v19, %v358_v18  ;;  %v596_v23 = vpack.c.bf16 %v361_v22, %v360_v21  ;;  %v253_v27 = vld [vmem:[%s1026_s2] sm:$0x3] }
  0x21   : > { %549 = vmatpush1.bf16.msra.mxu0 %v548_v41  ;;  %v262_v29 = vrot.slane %v253_v27, %v261_v28  ;;  %v524_v36 = vld [vmem:[%s1028_s4] ss:$0 sm:$0xff]  ;;  %p641_p12 = pnand %p640_p11, %p774_p5  ;;  %p648_p2 = por %p647_p1, %p646_p0 }
  0x22   : > { %551 = vmatprep.subr.bf16.mxu0 %v550_v42  ;;  %573 = vmatpush1.bf16.msra.mxu1 %v572_v56 }
  0x23   : > { %574 = vmatprep.subr.bf16.mxu1 %v704_v8  ;;  %p642_p13 = pneg %p641_p12 }
  0x25   : > { %553 = vmatpush1.bf16.msra.mxu0 %v552_v50  ;;  %p649_p3 = pnand %p648_p2, %p642_p13 }
  0x26   : > { %555 = vmatprep.subr.bf16.mxu0 %v554_v51  ;;  %576 = vmatpush1.bf16.msra.mxu1 %v575_v63 }
  0x27   : > { %577 = vmatprep.subr.bf16.mxu1 %v704_v8 }
  0x29   : > { %557 = vmatpush1.bf16.msra.mxu0 %v556_v59 }
  0x2a   : > { %559 = vmatprep.subr.bf16.mxu0 %v558_v60  ;;  %579 = vmatpush1.bf16.msra.mxu1 %v578_v3 }
  0x2b   : > { %580 = vmatprep.subr.bf16.mxu1 %v704_v8 }
  0x2d   : > { %561 = vmatpush1.bf16.msra.mxu0 %v560_v2 }
  0x2e   : > { %582 = vmatpush1.bf16.msra.mxu1 %v581_v7 }
  0x2f   : > { %583 = vmatprep.subr.bf16.mxu1 %v704_v8 }
  0x30   : > { %330 = vmatmul.mubr.f32.vlgmr.msra.gmra.mrb[0].mxu0 %v220_v6 }
  0x32   : > { %585 = vmatpush1.bf16.msra.mxu1 %v584_v11 }
  0x33   : > { %586 = vmatprep.subr.bf16.mxu1 %v704_v8 }
  0x36   : > { %588 = vmatpush1.bf16.msra.mxu1 %v587_v14 }
  0x37   : > { %589 = vmatprep.subr.bf16.mxu1 %v704_v8 }
  0x3a   : > { %591 = vmatpush1.bf16.msra.mxu1 %v590_v17 }
  0x3b   : > { %592 = vmatprep.subr.bf16.mxu1 %v704_v8 }
  0x3e   : > { %594 = vmatpush1.bf16.msra.mxu1 %v593_v20 }
  0x3f   : > { %595 = vmatprep.subr.bf16.mxu1 %v704_v8  ;;  %v258_v8 = vrot.slane %v253_v27, %v257_v26 }
  0x42   : > { %597 = vmatpush1.bf16.msra.mxu1 %v596_v23 }
 0x103   : > { %v331_v30 = vpop.f32.mrb[0].mxu0 }
 0x104   : > { %v332_v31 = vadd.f32 %v331_v30, %v258_v8  ;;  %v333_v32 = vpop.f32.mrb[1].mxu0 }
 0x105   : > { %v334_v33 = vadd.f32 %v333_v32, %v262_v29 }
 0x106   : > { %v336_v35 = vmax.f32 %v332_v31, 0.0 }
 0x107   : > { %v337_v34 = vmax.f32 %v334_v33, 0.0 }
 0x109   : > { %525 = vmatprep.mubr.msk.f32.mxu1 %vm369_vm0, %v337_v34 }
 0x10a   : > { %438 = vmatmul.mubr.f32.vlgmr.msra.gmra.mrb[0].mxu1 %v336_v35 }
 0x1dd   : > { %v439_v37 = vpop.f32.mrb[0].mxu1 }
 0x1de   : > { %v440_v38 = vadd.f32 %v524_v36, %v439_v37  ;;  %v441_v39 = vpop.f32.mrb[1].mxu1 }
 0x1e0   : > { %v443_v40 = vpack.c.bf16 %v440_v38, %v440_v38 }
 0x1e2   : > { %444 = vst [vmem:[%s215_s23] sm:$0xf] %v443_v40 }
 0x1e3   : > { %652 = shalt.err (!%p649_p3)
}
 0x1e4   : > { %s653_s10 = scalar_lea.hbm %s982_s30, 64  ;;  %s657_s13 = scalar_lea.hbm %s1029_s5, 128 }
 0x1e5   : > { %p654_p4 = scmp.ne.s32.totalorder %s982_s30, %s653_s10  ;;  %p658_p9 = scmp.lt.u32.totalorder %s982_s30, %s1029_s5 }
 0x1e6   : > { %p659_p10 = scmp.lt.u32.totalorder %s657_s13, %s653_s10  ;;  %p661_p12 = scmp.lt.u32.totalorder %s653_s10, %s982_s30 }
 0x1e7   : > { %p655_p7 = pnand %p654_p4, %p774_p5 }
 0x1e8   : > { %p660_p11 = por %p659_p10, %p658_p9 }
 0x1e9   : > { %p656_p8 = pneg %p655_p7 }
 0x1ea   : > { %p662_p13 = por %p661_p12, %p660_p11 }
 0x1ec   : > { %p663_p0 = pnand %p662_p13, %p656_p8 }
 0x1ee   : > { %666 = shalt.err (!%p663_p0)
}
 0x1ef   : > { %598 = dma.vmem_to_hbm [thread:$0]  (%p774_p5), %s984_s17, 64, %s982_s30, %s446_s6  }
 0x1f0 PF: > { %p604_p1 = scmp.ge.s32.totalorder %s701_s21, 2  ;;  %s471_s16 = sand.u32 1, %s689_s18  }
 0x1f1   : > { %s472_s23 = scalar_lea.sflag [#allocation3], %s471_s16 }
 0x1f2   : > { %p601_p2 = pnand %p604_p1, %p778_p6 }
 0x1f4   : > { %684 = dma.done.wait (!%p601_p2), %s472_s23, 64  }
 0x1f5   : > { %686 = vsyncadd (!%p601_p2), %s472_s23, 4294967232  ;;  %p15_p3 = scmp.ge.s32.totalorder %s761_s24, 4   ;;  %s1032_s18 = smov %s693_s19 }
 0x1f6   : > { %s1033_s19 = smov %s697_s20  ;;  %s1034_s20 = smov %s772_s27 }
 0x1f7   : > { %s1035_s21 = smov %s761_s24  ;;  %17 = sbr.rel (!%p15_p3) target bundleno = 3 (0x3), region = 75 }
 0x1fe   :  { %477 = vsyncpa [#allocation3], 1 }
 0x1ff   :  { %479 = vsyncpa [#allocation3 + $0x1], 1 }

</bundles_post_ra>
